<compile_context>
chip_gen: v7x
topology: tpu7x:2x2x1
jax: 0.10.0
libtpu: 0.0.40
codegen_flags: <defaults>
</compile_context>

<pallas_src>
import functools

import jax
import jax.numpy as jnp
from jax import lax
from jax.experimental import pallas as pl
from jax.experimental.pallas import tpu as pltpu

LANE = 128      # vreg lane width (last-dim tiling unit)
ROW_PAD = 16    # node-dim padding granularity (bf16 sublane tile; >= f32's 8)


def _round_up(n, m):
    return ((n + m - 1) // m) * m


def _pad2d(arr, rows, cols, dtype):
    out = jnp.zeros((rows, cols), dtype)
    return out.at[: arr.shape[0], : arr.shape[1]].set(arr.astype(dtype))


# ----------------------------------------------------------------------------
# Fused Pallas kernel: encoder (2 GCN layers) -> reparameterize -> decoder
# (2 GCN layers).  Single launch, all intermediates live in VMEM/vregs.
# ----------------------------------------------------------------------------
def _gvae_fused_kernel(a_ref, x_ref,
                       w1_ref, b1_ref, w2_ref, b2_ref,
                       eps_ref,
                       w3_ref, b3_ref, w4_ref, b4_ref,
                       xr_ref, mu_ref, ls_ref, zs_ref):
    f32, bf16 = jnp.float32, jnp.bfloat16
    a = a_ref[...]                       # (Np, Np) bf16 normalized adjacency

    def gcn(x_bf, w_ref, b_ref, relu):
        # out = A_hat @ (X @ W) + b  -- bf16 MXU inputs, f32 accumulation.
        xw = jnp.dot(x_bf, w_ref[...], preferred_element_type=f32)
        out = jnp.dot(a, xw.astype(bf16), preferred_element_type=f32)
        out = out + b_ref[...]
        if relu:
            out = jnp.maximum(out, 0.0)
        return out

    # ---- encoder: z = A @ (relu(A @ (X W1) + b1) W2) + b2 ----
    h = gcn(x_ref[...], w1_ref, b1_ref, relu=True)           # (Np, Hp) f32
    z = gcn(h.astype(bf16), w2_ref, b2_ref, relu=False)      # (Np, 2*Ep) f32

    ep = mu_ref.shape[1]
    mu = z[:, :ep]               # mu lives in lane block [0, Ep)
    log_std = z[:, ep:]          # log_std lives in lane block [Ep, 2*Ep)

    # ---- reparameterization: z_s = eps * exp(log_std) + mu ----
    z_sampled = eps_ref[...] * jnp.exp(log_std) + mu

    # ---- decoder: x_recon = A @ (relu(A @ (z_s W3) + b3) W4) + b4 ----
    h2 = gcn(z_sampled.astype(bf16), w3_ref, b3_ref, relu=True)
    x_recon = gcn(h2.astype(bf16), w4_ref, b4_ref, relu=False)

    xr_ref[...] = x_recon
    mu_ref[...] = mu
    ls_ref[...] = log_std
    zs_ref[...] = z_sampled


# ----------------------------------------------------------------------------
# Wrapper: pad once to lane-dense shapes, run the fused kernel, strip padding.
# ----------------------------------------------------------------------------
def gvae_forward(params, x, a_hat, eps, *, embedding_dim=2):
    """Mirrors GVAE.forward: returns (x_recon, mu, log_std, z_sampled)."""
    n, f = x.shape
    hidden = params["enc_w1"].shape[1]
    emb = embedding_dim

    n_pad = _round_up(max(n, ROW_PAD), ROW_PAD)
    f_pad = _round_up(f, LANE)
    h_pad = _round_up(hidden, LANE)
    e_pad = _round_up(emb, LANE)

    f32, bf16 = jnp.float32, jnp.bfloat16

    # Zero-padded, lane-dense operands (bf16 for MXU inputs, f32 bias/eps).
    a_p = _pad2d(a_hat, n_pad, n_pad, bf16)
    x_p = _pad2d(x, n_pad, f_pad, bf16)
    w1_p = _pad2d(params["enc_w1"], f_pad, h_pad, bf16)
    b1_p = _pad2d(params["enc_b1"], 1, h_pad, f32)

    # Encoder layer 2 produces [mu | log_std]; place the two column groups in
    # SEPARATE 128-lane blocks so the in-kernel split is lane-aligned.
    w2, b2 = params["enc_w2"], params["enc_b2"]
    w2_p = jnp.zeros((h_pad, 2 * e_pad), bf16)
    w2_p = w2_p.at[:hidden, :emb].set(w2[:, :emb].astype(bf16))
    w2_p = w2_p.at[:hidden, e_pad:e_pad + emb].set(w2[:, emb:].astype(bf16))
    b2_p = jnp.zeros((1, 2 * e_pad), f32)
    b2_p = b2_p.at[:, :emb].set(b2[:, :emb])
    b2_p = b2_p.at[:, e_pad:e_pad + emb].set(b2[:, emb:])

    eps_p = _pad2d(eps, n_pad, e_pad, f32)
    w3_p = _pad2d(params["dec_w1"], e_pad, h_pad, bf16)
    b3_p = _pad2d(params["dec_b1"], 1, h_pad, f32)
    w4_p = _pad2d(params["dec_w2"], h_pad, f_pad, bf16)
    b4_p = _pad2d(params["dec_b2"], 1, f_pad, f32)

    vmem = pl.BlockSpec(memory_space=pltpu.MemorySpace.VMEM)
    xr_p, mu_p, ls_p, zs_p = pl.pallas_call(
        _gvae_fused_kernel,
        out_shape=(
            jax.ShapeDtypeStruct((n_pad, f_pad), f32),
            jax.ShapeDtypeStruct((n_pad, e_pad), f32),
            jax.ShapeDtypeStruct((n_pad, e_pad), f32),
            jax.ShapeDtypeStruct((n_pad, e_pad), f32),
        ),
        in_specs=[vmem] * 11,
        out_specs=(vmem, vmem, vmem, vmem),
    )(a_p, x_p, w1_p, b1_p, w2_p, b2_p, eps_p, w3_p, b3_p, w4_p, b4_p)

    return (xr_p[:n, :f],
            mu_p[:n, :emb],
            ls_p[:n, :emb],
            zs_p[:n, :emb])


# ----------------------------------------------------------------------------
# Plain-JAX glue (computed once, outside the per-forward path)
# ----------------------------------------------------------------------------
def normalized_adjacency(edge_index, num_nodes):
    """Dense GCN-normalized adjacency D^{-1/2} (A with self-loops) D^{-1/2}.

    The diagonal is *set* (not added) to 1 so pre-existing self-loops in
    edge_index do not double-count.
    """
    src, dst = edge_index[0], edge_index[1]
    a = jnp.zeros((num_nodes, num_nodes), jnp.float32).at[src, dst].set(1.0)
    diag = jnp.arange(num_nodes)
    a = a.at[diag, diag].set(1.0)
    deg = jnp.sum(a, axis=1)
    d_inv_sqrt = lax.rsqrt(deg)
    return a * d_inv_sqrt[:, None] * d_inv_sqrt[None, :]


def init_params(key, in_features, hidden, embedding_dim):
    """Deterministic glorot-uniform weights, zero biases (synthetic init)."""
    ks = jax.random.split(key, 4)

    def glorot(k, shape):
        lim = jnp.sqrt(6.0 / (shape[0] + shape[1]))
        return jax.random.uniform(k, shape, jnp.float32, -lim, lim)

    return {
        "enc_w1": glorot(ks[0], (in_features, hidden)),
        "enc_b1": jnp.zeros((1, hidden), jnp.float32),
        "enc_w2": glorot(ks[1], (hidden, 2 * embedding_dim)),
        "enc_b2": jnp.zeros((1, 2 * embedding_dim), jnp.float32),
        "dec_w1": glorot(ks[2], (embedding_dim, hidden)),
        "dec_b1": jnp.zeros((1, hidden), jnp.float32),
        "dec_w2": glorot(ks[3], (hidden, in_features)),
        "dec_b2": jnp.zeros((1, in_features), jnp.float32),
    }


# ----------------------------------------------------------------------------
# Main
# ----------------------------------------------------------------------------
if __name__ == "__main__":
    N = 16           # number of graph nodes
    IN_FEATURES = 8  # node feature dim
    HIDDEN = 32      # GCN hidden dim
    EMBEDDING_DIM = 2

    root = jax.random.PRNGKey(0)
    k_x, k_eps, k_params = jax.random.split(root, 3)

    # Node features [N, F].
    x = jax.random.normal(k_x, (N, IN_FEATURES), dtype=jnp.float32)

    # Ring graph edge_index [2, 2N] (both directions).
    src = jnp.arange(N, dtype=jnp.int32)
    dst = (src + 1) % N
    edge_index = jnp.stack(
        [jnp.concatenate([src, dst]), jnp.concatenate([dst, src])], axis=0
    )

    # TODO(synk): torch.randn_like uses torch's global RNG; we draw eps with a
    # fixed JAX key instead (bitwise parity with torch RNG is not reproducible).
    eps = jax.random.normal(k_eps, (N, EMBEDDING_DIM), dtype=jnp.float32)

    params = init_params(k_params, IN_FEATURES, HIDDEN, EMBEDDING_DIM)

    # A_hat is static per graph: build it once, outside the forward path.
    a_hat = normalized_adjacency(edge_index, N)

    fwd = jax.jit(functools.partial(gvae_forward, embedding_dim=EMBEDDING_DIM))
    x_recon, mu, log_std, z_sampled = fwd(params, x, a_hat, eps)
    jax.block_until_ready((x_recon, mu, log_std, z_sampled))

    assert x_recon.shape == (N, IN_FEATURES)
    assert mu.shape == (N, EMBEDDING_DIM)
    assert log_std.shape == (N, EMBEDDING_DIM)
    assert z_sampled.shape == (N, EMBEDDING_DIM)
    assert bool(jnp.all(jnp.isfinite(x_recon)))

    print("KERNEL_OK")
</pallas_src>

<mosaic_0001>
module attributes {stable_mosaic.version = 11 : i64} {
  func.func @_gvae_fused_kernel(%arg0: memref<16x16xbf16, #tpu.memory_space<vmem>>, %arg1: memref<16x128xbf16, #tpu.memory_space<vmem>>, %arg2: memref<128x128xbf16, #tpu.memory_space<vmem>>, %arg3: memref<1x128xf32, #tpu.memory_space<vmem>>, %arg4: memref<128x256xbf16, #tpu.memory_space<vmem>>, %arg5: memref<1x256xf32, #tpu.memory_space<vmem>>, %arg6: memref<16x128xf32, #tpu.memory_space<vmem>>, %arg7: memref<128x128xbf16, #tpu.memory_space<vmem>>, %arg8: memref<1x128xf32, #tpu.memory_space<vmem>>, %arg9: memref<128x128xbf16, #tpu.memory_space<vmem>>, %arg10: memref<1x128xf32, #tpu.memory_space<vmem>>, %arg11: memref<16x128xf32, #tpu.memory_space<vmem>>, %arg12: memref<16x128xf32, #tpu.memory_space<vmem>>, %arg13: memref<16x128xf32, #tpu.memory_space<vmem>>, %arg14: memref<16x128xf32, #tpu.memory_space<vmem>>) attributes {dimension_semantics = [], scalar_prefetch = 0 : i64, scratch_operands = 0 : i64, tpu.core_type = #tpu.core_type<tc>} {
    %c0 = arith.constant 0 : index
    %c0_0 = arith.constant 0 : index
    %0 = vector.load %arg0[%c0, %c0_0] : memref<16x16xbf16, #tpu.memory_space<vmem>>, vector<16x16xbf16>
    %c0_1 = arith.constant 0 : index
    %c0_2 = arith.constant 0 : index
    %1 = vector.load %arg1[%c0_1, %c0_2] : memref<16x128xbf16, #tpu.memory_space<vmem>>, vector<16x128xbf16>
    %c0_3 = arith.constant 0 : index
    %c0_4 = arith.constant 0 : index
    %2 = vector.load %arg2[%c0_3, %c0_4] : memref<128x128xbf16, #tpu.memory_space<vmem>>, vector<128x128xbf16>
    %cst = arith.constant dense<0.000000e+00> : vector<16x128xf32>
    %3 = tpu.matmul %1, %2, %cst {dimension_numbers = #tpu.dot_dimension_numbers<[1], [0], [0], [1], [0, 0, 1, 1], [], []>} : vector<16x128xbf16>, vector<128x128xbf16>, vector<16x128xf32> -> vector<16x128xf32>
    %4 = arith.truncf %3 : vector<16x128xf32> to vector<16x128xbf16>
    %cst_5 = arith.constant dense<0.000000e+00> : vector<16x128xf32>
    %5 = tpu.matmul %0, %4, %cst_5 {dimension_numbers = #tpu.dot_dimension_numbers<[1], [0], [0], [1], [0, 0, 1, 1], [], []>} : vector<16x16xbf16>, vector<16x128xbf16>, vector<16x128xf32> -> vector<16x128xf32>
    %c0_6 = arith.constant 0 : index
    %c0_7 = arith.constant 0 : index
    %6 = vector.load %arg3[%c0_6, %c0_7] : memref<1x128xf32, #tpu.memory_space<vmem>>, vector<1x128xf32>
    %7 = vector.broadcast %6 : vector<1x128xf32> to vector<16x128xf32>
    %8 = arith.addf %5, %7 : vector<16x128xf32>
    %cst_8 = arith.constant 0.000000e+00 : f32
    %9 = vector.broadcast %cst_8 : f32 to vector<16x128xf32>
    %10 = arith.maximumf %8, %9 : vector<16x128xf32>
    %11 = arith.truncf %10 : vector<16x128xf32> to vector<16x128xbf16>
    %c0_9 = arith.constant 0 : index
    %c0_10 = arith.constant 0 : index
    %12 = vector.load %arg4[%c0_9, %c0_10] : memref<128x256xbf16, #tpu.memory_space<vmem>>, vector<128x256xbf16>
    %cst_11 = arith.constant dense<0.000000e+00> : vector<16x256xf32>
    %13 = tpu.matmul %11, %12, %cst_11 {dimension_numbers = #tpu.dot_dimension_numbers<[1], [0], [0], [1], [0, 0, 1, 1], [], []>} : vector<16x128xbf16>, vector<128x256xbf16>, vector<16x256xf32> -> vector<16x256xf32>
    %14 = arith.truncf %13 : vector<16x256xf32> to vector<16x256xbf16>
    %cst_12 = arith.constant dense<0.000000e+00> : vector<16x256xf32>
    %15 = tpu.matmul %0, %14, %cst_12 {dimension_numbers = #tpu.dot_dimension_numbers<[1], [0], [0], [1], [0, 0, 1, 1], [], []>} : vector<16x16xbf16>, vector<16x256xbf16>, vector<16x256xf32> -> vector<16x256xf32>
    %c0_13 = arith.constant 0 : index
    %c0_14 = arith.constant 0 : index
    %16 = vector.load %arg5[%c0_13, %c0_14] : memref<1x256xf32, #tpu.memory_space<vmem>>, vector<1x256xf32>
    %17 = vector.broadcast %16 : vector<1x256xf32> to vector<16x256xf32>
    %18 = arith.addf %15, %17 : vector<16x256xf32>
    %19 = vector.extract_strided_slice %18 {offsets = [0, 0], sizes = [16, 128], strides = [1, 1]} : vector<16x256xf32> to vector<16x128xf32>
    %20 = vector.extract_strided_slice %18 {offsets = [0, 128], sizes = [16, 128], strides = [1, 1]} : vector<16x256xf32> to vector<16x128xf32>
    %c0_15 = arith.constant 0 : index
    %c0_16 = arith.constant 0 : index
    %21 = vector.load %arg6[%c0_15, %c0_16] : memref<16x128xf32, #tpu.memory_space<vmem>>, vector<16x128xf32>
    %22 = math.exp %20 : vector<16x128xf32>
    %23 = arith.mulf %21, %22 : vector<16x128xf32>
    %24 = arith.addf %23, %19 : vector<16x128xf32>
    %25 = arith.truncf %24 : vector<16x128xf32> to vector<16x128xbf16>
    %c0_17 = arith.constant 0 : index
    %c0_18 = arith.constant 0 : index
    %26 = vector.load %arg7[%c0_17, %c0_18] : memref<128x128xbf16, #tpu.memory_space<vmem>>, vector<128x128xbf16>
    %cst_19 = arith.constant dense<0.000000e+00> : vector<16x128xf32>
    %27 = tpu.matmul %25, %26, %cst_19 {dimension_numbers = #tpu.dot_dimension_numbers<[1], [0], [0], [1], [0, 0, 1, 1], [], []>} : vector<16x128xbf16>, vector<128x128xbf16>, vector<16x128xf32> -> vector<16x128xf32>
    %28 = arith.truncf %27 : vector<16x128xf32> to vector<16x128xbf16>
    %cst_20 = arith.constant dense<0.000000e+00> : vector<16x128xf32>
    %29 = tpu.matmul %0, %28, %cst_20 {dimension_numbers = #tpu.dot_dimension_numbers<[1], [0], [0], [1], [0, 0, 1, 1], [], []>} : vector<16x16xbf16>, vector<16x128xbf16>, vector<16x128xf32> -> vector<16x128xf32>
    %c0_21 = arith.constant 0 : index
    %c0_22 = arith.constant 0 : index
    %30 = vector.load %arg8[%c0_21, %c0_22] : memref<1x128xf32, #tpu.memory_space<vmem>>, vector<1x128xf32>
    %31 = vector.broadcast %30 : vector<1x128xf32> to vector<16x128xf32>
    %32 = arith.addf %29, %31 : vector<16x128xf32>
    %cst_23 = arith.constant 0.000000e+00 : f32
    %33 = vector.broadcast %cst_23 : f32 to vector<16x128xf32>
    %34 = arith.maximumf %32, %33 : vector<16x128xf32>
    %35 = arith.truncf %34 : vector<16x128xf32> to vector<16x128xbf16>
    %c0_24 = arith.constant 0 : index
    %c0_25 = arith.constant 0 : index
    %36 = vector.load %arg9[%c0_24, %c0_25] : memref<128x128xbf16, #tpu.memory_space<vmem>>, vector<128x128xbf16>
    %cst_26 = arith.constant dense<0.000000e+00> : vector<16x128xf32>
    %37 = tpu.matmul %35, %36, %cst_26 {dimension_numbers = #tpu.dot_dimension_numbers<[1], [0], [0], [1], [0, 0, 1, 1], [], []>} : vector<16x128xbf16>, vector<128x128xbf16>, vector<16x128xf32> -> vector<16x128xf32>
    %38 = arith.truncf %37 : vector<16x128xf32> to vector<16x128xbf16>
    %cst_27 = arith.constant dense<0.000000e+00> : vector<16x128xf32>
    %39 = tpu.matmul %0, %38, %cst_27 {dimension_numbers = #tpu.dot_dimension_numbers<[1], [0], [0], [1], [0, 0, 1, 1], [], []>} : vector<16x16xbf16>, vector<16x128xbf16>, vector<16x128xf32> -> vector<16x128xf32>
    %c0_28 = arith.constant 0 : index
    %c0_29 = arith.constant 0 : index
    %40 = vector.load %arg10[%c0_28, %c0_29] : memref<1x128xf32, #tpu.memory_space<vmem>>, vector<1x128xf32>
    %41 = vector.broadcast %40 : vector<1x128xf32> to vector<16x128xf32>
    %42 = arith.addf %39, %41 : vector<16x128xf32>
    %c0_30 = arith.constant 0 : index
    %c0_31 = arith.constant 0 : index
    %43 = vector.load %arg11[%c0_30, %c0_31] : memref<16x128xf32, #tpu.memory_space<vmem>>, vector<16x128xf32>
    tpu.vector_store %arg11[%c0_30, %c0_31], %42 {strides = array<i32>} : memref<16x128xf32, #tpu.memory_space<vmem>>, vector<16x128xf32>,
    %c0_32 = arith.constant 0 : index
    %c0_33 = arith.constant 0 : index
    %44 = vector.load %arg12[%c0_32, %c0_33] : memref<16x128xf32, #tpu.memory_space<vmem>>, vector<16x128xf32>
    tpu.vector_store %arg12[%c0_32, %c0_33], %19 {strides = array<i32>} : memref<16x128xf32, #tpu.memory_space<vmem>>, vector<16x128xf32>,
    %c0_34 = arith.constant 0 : index
    %c0_35 = arith.constant 0 : index
    %45 = vector.load %arg13[%c0_34, %c0_35] : memref<16x128xf32, #tpu.memory_space<vmem>>, vector<16x128xf32>
    tpu.vector_store %arg13[%c0_34, %c0_35], %20 {strides = array<i32>} : memref<16x128xf32, #tpu.memory_space<vmem>>, vector<16x128xf32>,
    %c0_36 = arith.constant 0 : index
    %c0_37 = arith.constant 0 : index
    %46 = vector.load %arg14[%c0_36, %c0_37] : memref<16x128xf32, #tpu.memory_space<vmem>>, vector<16x128xf32>
    tpu.vector_store %arg14[%c0_36, %c0_37], %24 {strides = array<i32>} : memref<16x128xf32, #tpu.memory_space<vmem>>, vector<16x128xf32>,
    return
  }
}

</mosaic_0001>

<bundles_post_ra>
// kernel: gvae_forward.1
= control target key start
LH: loop header
LB: loop body
LE: loop exit
PB: predicated region body
PF: predicated region fallthrough
CT: control target
= control target key end

     0   :  { %v978_v0 = vmov 0.0   ;;  %vm979_vm0 = vmmov 0   ;;  %vm171_vm1 = vcmask 130048   ;;  %v980_v32 = vmov 0   ;;  %s1273_s2 = inlined_call_operand.vmem [shape: bf16[128,128], index: 2, kind: input, shape index: {}]   ;;  %s1274_s1 = inlined_call_operand.vmem [shape: bf16[16,128], index: 1, kind: input, shape index: {}]   ;;  %s1275_s0 = inlined_call_operand.vmem [shape: bf16[16,16], index: 0, kind: input, shape index: {}]   ;;  %s1276_s4 = inlined_call_operand.vmem [shape: bf16[128,256], index: 4, kind: input, shape index: {}]   ;;  %s1277_s3 = inlined_call_operand.vmem [shape: f32[1,128], index: 3, kind: input, shape index: {}]   ;;  %s1278_s7 = inlined_call_operand.vmem [shape: bf16[128,128], index: 7, kind: input, shape index: {}]   ;;  %s1279_s5 = inlined_call_operand.vmem [shape: f32[1,256], index: 5, kind: input, shape index: {}]   ;;  %s1280_s12 = inlined_call_operand.vmem [shape: f32[16,128], index: 12, kind: output, shape index: {1}]   ;;  %s1281_s13 = inlined_call_operand.vmem [shape: f32[16,128], index: 13, kind: output, shape index: {2}]   ;;  %s1282_s6 = inlined_call_operand.vmem [shape: f32[16,128], index: 6, kind: input, shape index: {}]   ;;  %s1283_s14 = inlined_call_operand.vmem [shape: f32[16,128], index: 14, kind: output, shape index: {3}]   ;;  %s1284_s9 = inlined_call_operand.vmem [shape: bf16[128,128], index: 9, kind: input, shape index: {}]   ;;  %s1285_s8 = inlined_call_operand.vmem [shape: f32[1,128], index: 8, kind: input, shape index: {}]   ;;  %s1286_s10 = inlined_call_operand.vmem [shape: f32[1,128], index: 10, kind: input, shape index: {}]   ;;  %s1287_s11 = inlined_call_operand.vmem [shape: f32[16,128], index: 11, kind: output, shape index: {0}]  }
   0x1   :  { %843 = vmatprep.subr.bf16.mxu0 %v978_v0  ;;  %v924_v1 = vld [vmem:[%s1273_s2] sm:$0xff]   ;;  %859 = vmatprep.mubr.msk.bf16.mxu0 %vm979_vm0, %v978_v0  ;;  %v925_v2 = vld [vmem:[%s1273_s2 + $0x8] sm:$0xff]   ;;  %v926_v3 = vld [vmem:[%s1273_s2 + $0x10] sm:$0xff]   ;;  %v362_v57 = vlaneseq }
   0x2   :  { %863 = vmatprep.subr.bf16.mxu1 %v978_v0  ;;  %865 = vmatprep.mubr.msk.bf16.mxu1 %vm979_vm0, %v978_v0  ;;  %v927_v4 = vld [vmem:[%s1273_s2 + $0x18] sm:$0xff]   ;;  %v928_v5 = vld [vmem:[%s1273_s2 + $0x20] sm:$0xff]   ;;  %v929_v6 = vld [vmem:[%s1273_s2 + $0x28] sm:$0xff]  }
   0x3   :  { %844 = vmatpush3.bf16.msra.mxu0 %v924_v1  ;;  %v930_v7 = vld [vmem:[%s1273_s2 + $0x30] sm:$0xff]   ;;  %v931_v8 = vld [vmem:[%s1273_s2 + $0x38] sm:$0xff]   ;;  %v932_v9 = vld [vmem:[%s1274_s1] sm:$0xff]   ;;  %v363_v58 = vshrl.u32 %v362_v57, 7 }
   0x4   :  { %845 = vmatprep.subr.bf16.mxu0 %v978_v0  ;;  %v936_v13 = vld [vmem:[%s1276_s4 + $0x4] ss:$8 sps:$4 sm:$0xff]   ;;  %v934_v17 = vld [vmem:[%s1276_s4] ss:$8 sps:$4 sm:$0xff]   ;;  %v939_v18 = vld [vmem:[%s1276_s4 + $0x14] ss:$8 sps:$4 sm:$0xff]  }
   0x5   :  { %v1102_v16 = vld [vmem:[%s1275_s0] sm:$0xff]   ;;  %v937_v19 = vld [vmem:[%s1276_s4 + $0x10] ss:$8 sps:$4 sm:$0xff]   ;;  %v945_v22 = vld [vmem:[%s1276_s4 + $0x34] ss:$8 sps:$4 sm:$0xff]   ;;  %v364_v59 = vsub.s32 0, %v363_v58 }
   0x6   :  { %v942_v20 = vld [vmem:[%s1276_s4 + $0x24] ss:$8 sps:$4 sm:$0xff]   ;;  %v940_v21 = vld [vmem:[%s1276_s4 + $0x20] ss:$8 sps:$4 sm:$0xff]   ;;  %v943_v23 = vld [vmem:[%s1276_s4 + $0x30] ss:$8 sps:$4 sm:$0xff]  }
   0x7   :  { %846 = vmatpush3.bf16.msra.mxu0 %v925_v2  ;;  %v948_v24 = vld [vmem:[%s1276_s4 + $0x44] ss:$8 sps:$4 sm:$0xff]   ;;  %v946_v25 = vld [vmem:[%s1276_s4 + $0x40] ss:$8 sps:$4 sm:$0xff]   ;;  %v951_v26 = vld [vmem:[%s1276_s4 + $0x54] ss:$8 sps:$4 sm:$0xff]  }
   0x8   :  { %847 = vmatprep.subr.bf16.mxu0 %v978_v0  ;;  %v949_v27 = vld [vmem:[%s1276_s4 + $0x50] ss:$8 sps:$4 sm:$0xff]   ;;  %v954_v28 = vld [vmem:[%s1276_s4 + $0x64] ss:$8 sps:$4 sm:$0xff]   ;;  %v952_v29 = vld [vmem:[%s1276_s4 + $0x60] ss:$8 sps:$4 sm:$0xff]  }
   0x9   :  { %v957_v30 = vld [vmem:[%s1276_s4 + $0x74] ss:$8 sps:$4 sm:$0xff]   ;;  %v955_v31 = vld [vmem:[%s1276_s4 + $0x70] ss:$8 sps:$4 sm:$0xff]   ;;  %v770_v33 = vld [vmem:[%s1277_s3] ss:$0 sm:$0xff] }
   0xa   :  { %v958_v43 = vld [vmem:[%s1278_s7] sm:$0xff]   ;;  %v959_v44 = vld [vmem:[%s1278_s7 + $0x8] sm:$0xff]   ;;  %v960_v51 = vld [vmem:[%s1278_s7 + $0x10] sm:$0xff]   ;;  %v368_v61 = vsub.s32 1, %v363_v58 }
   0xb   :  { %848 = vmatpush3.bf16.msra.mxu0 %v926_v3  ;;  %v961_v52 = vld [vmem:[%s1278_s7 + $0x18] sm:$0xff]   ;;  %v962_v53 = vld [vmem:[%s1278_s7 + $0x20] sm:$0xff]   ;;  %v963_v54 = vld [vmem:[%s1278_s7 + $0x28] sm:$0xff]  }
   0xc   :  { %849 = vmatprep.subr.bf16.mxu0 %v978_v0  ;;  %v964_v55 = vld [vmem:[%s1278_s7 + $0x30] sm:$0xff]   ;;  %v965_v56 = vld [vmem:[%s1278_s7 + $0x38] sm:$0xff]   ;;  %v360_v60 = vld [vmem:[%s1279_s5] sm:$0x3] }
   0xd   :  { %v365_v62 = vrot.slane %v360_v60, %v364_v59  ;;  %v369_v63 = vrot.slane %v360_v60, %v368_v61 }
   0xf   :  { %850 = vmatpush3.bf16.msra.mxu0 %v927_v4 }
  0x10   :  { %851 = vmatprep.subr.bf16.mxu0 %v978_v0 }
  0x13   :  { %852 = vmatpush3.bf16.msra.mxu0 %v928_v5 }
  0x14   :  { %853 = vmatprep.subr.bf16.mxu0 %v978_v0 }
  0x17   :  { %854 = vmatpush3.bf16.msra.mxu0 %v929_v6 }
  0x18   :  { %855 = vmatprep.subr.bf16.mxu0 %v978_v0 }
  0x1b   :  { %856 = vmatpush3.bf16.msra.mxu0 %v930_v7 }
  0x1c   :  { %857 = vmatprep.subr.bf16.mxu0 %v978_v0 }
  0x1f   :  { %858 = vmatpush3.bf16.msra.mxu0 %v931_v8 }
  0x22   :  { %860 = vmatmul.mubr.bf16.vlgmr.msra.gmra.mrb[0].mxu0 %v932_v9 }
  0x23   :  { %404 = vmatprep.mubr.bf16.mxu0 %v980_v32 }
  0xf5   :  { %v151_v10 = vpop.f32.mrb[0].mxu0 }
  0xf6   :  { %v861_v11 = vpop.f32.mrb[1].mxu0 }
  0xf7   :  { %v154_v12 = vpop.f32.mrb[2].mxu0  ;;  %v415_v11 = vld [vmem:[%s1282_s6] sm:$0xff] }
  0xf8   :  { %v158_v14 = vpack.c.bf16 %v154_v12, %v151_v10  ;;  %v862_v15 = vpop.f32.mrb[3].mxu0 }
  0xfa   :  { %864 = vmatpush3.bf16.msra.mxu1 %v158_v14 }
  0xfb   :  { %315 = vmatprep.subr.bf16.mxu1 %v936_v13  ;;  %v416_v13 = vld [vmem:[%s1282_s6 + $0x8] sm:$0xff] }
  0xfd   :  { %866 = vmatmul.mubr.msk.bf16.vlgmr.msra.gmra.mrb[0].mxu1 %vm171_vm1, %v1102_v16 }
  0xfe   :  { %316 = vmatpush1.bf16.msra.mxu1 %v934_v17  ;;  %347 = vmatprep.mubr.bf16.mxu1 %v980_v32  ;;  %v972_v32 = vld [vmem:[%s1284_s9 + $0x30] sm:$0xff]  }
  0xff   :  { %317 = vmatprep.subr.bf16.mxu1 %v939_v18 }
 0x102   :  { %318 = vmatpush1.bf16.msra.mxu1 %v937_v19 }
 0x103   :  { %319 = vmatprep.subr.bf16.mxu1 %v942_v20 }
 0x106   :  { %320 = vmatpush1.bf16.msra.mxu1 %v940_v21 }
 0x107   :  { %321 = vmatprep.subr.bf16.mxu1 %v945_v22 }
 0x10a   :  { %322 = vmatpush1.bf16.msra.mxu1 %v943_v23 }
 0x10b   :  { %323 = vmatprep.subr.bf16.mxu1 %v948_v24 }
 0x10e   :  { %324 = vmatpush1.bf16.msra.mxu1 %v946_v25 }
 0x10f   :  { %325 = vmatprep.subr.bf16.mxu1 %v951_v26  ;;  %v966_v26 = vld [vmem:[%s1284_s9] sm:$0xff]  }
 0x112   :  { %326 = vmatpush1.bf16.msra.mxu1 %v949_v27  ;;  %v967_v27 = vld [vmem:[%s1284_s9 + $0x8] sm:$0xff]  }
 0x113   :  { %327 = vmatprep.subr.bf16.mxu1 %v954_v28  ;;  %v968_v28 = vld [vmem:[%s1284_s9 + $0x10] sm:$0xff]  }
 0x116   :  { %328 = vmatpush1.bf16.msra.mxu1 %v952_v29  ;;  %v969_v29 = vld [vmem:[%s1284_s9 + $0x18] sm:$0xff]  }
 0x117   :  { %329 = vmatprep.subr.bf16.mxu1 %v957_v30  ;;  %v970_v30 = vld [vmem:[%s1284_s9 + $0x20] sm:$0xff]  }
 0x11a   :  { %330 = vmatpush1.bf16.msra.mxu1 %v955_v31  ;;  %v971_v31 = vld [vmem:[%s1284_s9 + $0x28] sm:$0xff]  }
 0x11b   :  { %869 = vmatprep.subr.bf16.mxu1 %v978_v0 }
 0x1d0   :  { %v209_v34 = vpop.f32.mrb[0].mxu1 }
 0x1d1   :  { %v210_v35 = vadd.f32 %v770_v33, %v209_v34  ;;  %v867_v36 = vpop.f32.mrb[1].mxu1  ;;  %v798_v34 = vld [vmem:[%s1285_s8] ss:$0 sm:$0xff] }
 0x1d2   :  { %v212_v37 = vpop.f32.mrb[2].mxu1 }
 0x1d3   :  { %v213_v38 = vadd.f32 %v770_v33, %v212_v37  ;;  %v868_v39 = vpop.f32.mrb[3].mxu1  ;;  %v216_v40 = vmax.f32 %v210_v35, 0.0  ;;  %v973_v33 = vld [vmem:[%s1284_s9 + $0x38] sm:$0xff]  }
 0x1d5   :  { %v217_v41 = vmax.f32 %v213_v38, 0.0 }
 0x1d7   :  { %v218_v42 = vpack.c.bf16 %v217_v41, %v216_v40 }
 0x1d9   :  { %348 = vmatmul.mubr.bf16.vlgmr.msra.gmra.mrb[4].mxu1 %v218_v42 }
 0x1da   :  { %885 = vmatprep.mubr.msk.bf16.mxu1 %vm979_vm0, %v978_v0  ;;  %870 = vmatpush3.bf16.msra.mxu1 %v958_v43 }
 0x1db   :  { %871 = vmatprep.subr.bf16.mxu1 %v978_v0 }
 0x1de   :  { %872 = vmatpush3.bf16.msra.mxu1 %v959_v44 }
 0x1df   :  { %873 = vmatprep.subr.bf16.mxu1 %v978_v0 }
 0x1e2   :  { %874 = vmatpush3.bf16.msra.mxu1 %v960_v51 }
 0x1e3   :  { %875 = vmatprep.subr.bf16.mxu1 %v978_v0 }
 0x1e6   :  { %876 = vmatpush3.bf16.msra.mxu1 %v961_v52 }
 0x1e7   :  { %877 = vmatprep.subr.bf16.mxu1 %v978_v0 }
 0x1ea   :  { %878 = vmatpush3.bf16.msra.mxu1 %v962_v53 }
 0x1eb   :  { %879 = vmatprep.subr.bf16.mxu1 %v978_v0 }
 0x1ee   :  { %880 = vmatpush3.bf16.msra.mxu1 %v963_v54 }
 0x1ef   :  { %881 = vmatprep.subr.bf16.mxu1 %v978_v0 }
 0x1f2   :  { %882 = vmatpush3.bf16.msra.mxu1 %v964_v55 }
 0x1f3   :  { %883 = vmatprep.subr.bf16.mxu1 %v978_v0 }
 0x1f6   :  { %884 = vmatpush3.bf16.msra.mxu1 %v965_v56 }
 0x1f7   :  { %915 = vmatprep.subr.bf16.mxu1 %v978_v0 }
 0x2ac   :  { %v349_v45 = vpop.f32.mrb[4].mxu1 }
 0x2ad   :  { %v351_v46 = vpop.f32.mrb[5].mxu1 }
 0x2ae   :  { %v353_v47 = vpop.f32.mrb[6].mxu1 }
 0x2af   :  { %v358_v48 = vpack.c.bf16 %v353_v47, %v349_v45  ;;  %v355_v49 = vpop.f32.mrb[7].mxu1 }
 0x2b0   :  { %v359_v50 = vpack.c.bf16 %v355_v49, %v351_v46 }
 0x2b2   :  { %372 = vmatprep.subr.bf16.mxu0 %v359_v50 }
 0x2b3   :  { %373 = vmatpush1.bf16.msra.mxu0 %v358_v48  ;;  %v808_v48 = vld [vmem:[%s1286_s10] ss:$0 sm:$0xff] }
 0x2b4   :  { %889 = vmatprep.subr.bf16.mxu0 %v978_v0 }
 0x2b6   :  { %789 = vmatmul.mubr.msk.bf16.vlgmr.msra.gmra.mrb[4].mxu0 %vm171_vm1, %v1102_v16 }
 0x2b7   :  { %891 = vmatprep.mubr.msk.bf16.mxu0 %vm979_vm0, %v978_v0 }
 0x389   :  { %v406_v1 = vpop.f32.mrb[4].mxu0 }
 0x38a   :  { %v407_v2 = vadd.f32 %v406_v1, %v365_v62  ;;  %v408_v3 = vpop.f32.mrb[5].mxu0 }
 0x38b   :  { %v409_v4 = vadd.f32 %v408_v3, %v369_v63  ;;  %v410_v5 = vpop.f32.mrb[6].mxu0 }
 0x38c   :  { %739 = vst [vmem:[%s1280_s12] sm:$0xff] %v407_v2  ;;  %v411_v6 = vadd.f32 %v410_v5, %v365_v62  ;;  %v412_v7 = vpop.f32.mrb[7].mxu0 }
 0x38d   :  { %v417_v8 = vmul.f32 1.442695, %v409_v4  ;;  %741 = vst [vmem:[%s1281_s13] sm:$0xff] %v409_v4  ;;  %v413_v9 = vadd.f32 %v412_v7, %v369_v63 }
 0x38e   :  { %740 = vst [vmem:[%s1280_s12 + $0x8] sm:$0xff] %v411_v6 }
 0x38f   :  { %974 = vpow2.f32 %v417_v8  ;;  %v419_v10 = vmul.f32 1.442695, %v413_v9  ;;  %742 = vst [vmem:[%s1281_s13 + $0x8] sm:$0xff] %v413_v9 }
 0x391   :  { %976 = vpow2.f32 %v419_v10 }
 0x399   :  { %v975_v12 = vpop.eup %974 }
 0x39a   :  { %v421_v14 = vmul.f32 %v975_v12, %v415_v11 }
 0x39b   :  { %v977_v15 = vpop.eup %976 }
 0x39c   :  { %v422_v17 = vmul.f32 %v977_v15, %v416_v13  ;;  %v423_v18 = vadd.f32 %v421_v14, %v407_v2 }
 0x39e   :  { %v424_v19 = vadd.f32 %v422_v17, %v411_v6  ;;  %743 = vst [vmem:[%s1283_s14] sm:$0xff] %v423_v18 }
 0x3a0   :  { %v425_v20 = vpack.c.bf16 %v424_v19, %v423_v18  ;;  %744 = vst [vmem:[%s1283_s14 + $0x8] sm:$0xff] %v424_v19 }
 0x3a2   :  { %886 = vmatmul.mubr.bf16.vlgmr.msra.gmra.mrb[8].mxu1 %v425_v20 }
 0x3a3   :  { %917 = vmatprep.mubr.msk.bf16.mxu1 %vm979_vm0, %v978_v0 }
 0x475   :  { %v524_v21 = vpop.f32.mrb[8].mxu1 }
 0x476   :  { %v887_v22 = vpop.f32.mrb[9].mxu1 }
 0x477   :  { %v527_v23 = vpop.f32.mrb[10].mxu1 }
 0x478   :  { %v531_v24 = vpack.c.bf16 %v527_v23, %v524_v21  ;;  %v888_v25 = vpop.f32.mrb[11].mxu1 }
 0x47a   :  { %890 = vmatpush3.bf16.msra.mxu0 %v531_v24 }
 0x47b   :  { %895 = vmatprep.subr.bf16.mxu0 %v978_v0 }
 0x47d   :  { %892 = vmatmul.mubr.msk.bf16.vlgmr.msra.gmra.mrb[8].mxu0 %vm171_vm1, %v1102_v16 }
 0x47e   :  { %896 = vmatpush3.bf16.msra.mxu0 %v966_v26  ;;  %911 = vmatprep.mubr.msk.bf16.mxu0 %vm979_vm0, %v978_v0 }
 0x47f   :  { %897 = vmatprep.subr.bf16.mxu0 %v978_v0 }
 0x482   :  { %898 = vmatpush3.bf16.msra.mxu0 %v967_v27 }
 0x483   :  { %899 = vmatprep.subr.bf16.mxu0 %v978_v0 }
 0x486   :  { %900 = vmatpush3.bf16.msra.mxu0 %v968_v28 }
 0x487   :  { %901 = vmatprep.subr.bf16.mxu0 %v978_v0 }
 0x48a   :  { %902 = vmatpush3.bf16.msra.mxu0 %v969_v29 }
 0x48b   :  { %903 = vmatprep.subr.bf16.mxu0 %v978_v0 }
 0x48e   :  { %904 = vmatpush3.bf16.msra.mxu0 %v970_v30 }
 0x48f   :  { %905 = vmatprep.subr.bf16.mxu0 %v978_v0 }
 0x492   :  { %906 = vmatpush3.bf16.msra.mxu0 %v971_v31 }
 0x493   :  { %907 = vmatprep.subr.bf16.mxu0 %v978_v0 }
 0x496   :  { %908 = vmatpush3.bf16.msra.mxu0 %v972_v32 }
 0x497   :  { %909 = vmatprep.subr.bf16.mxu0 %v978_v0 }
 0x49a   :  { %910 = vmatpush3.bf16.msra.mxu0 %v973_v33 }
 0x550   :  { %v573_v35 = vpop.f32.mrb[8].mxu0 }
 0x551   :  { %v574_v36 = vadd.f32 %v798_v34, %v573_v35  ;;  %v893_v37 = vpop.f32.mrb[9].mxu0 }
 0x552   :  { %v576_v38 = vpop.f32.mrb[10].mxu0 }
 0x553   :  { %v577_v39 = vadd.f32 %v798_v34, %v576_v38  ;;  %v894_v40 = vpop.f32.mrb[11].mxu0  ;;  %v580_v41 = vmax.f32 %v574_v36, 0.0 }
 0x555   :  { %v581_v42 = vmax.f32 %v577_v39, 0.0 }
 0x557   :  { %v582_v43 = vpack.c.bf16 %v581_v42, %v580_v41 }
 0x559   :  { %912 = vmatmul.mubr.bf16.vlgmr.msra.gmra.mrb[12].mxu0 %v582_v43 }
 0x62c   :  { %v681_v0 = vpop.f32.mrb[12].mxu0 }
 0x62d   :  { %v913_v44 = vpop.f32.mrb[13].mxu0 }
 0x62e   :  { %v684_v45 = vpop.f32.mrb[14].mxu0 }
 0x62f   :  { %v688_v46 = vpack.c.bf16 %v684_v45, %v681_v0  ;;  %v914_v47 = vpop.f32.mrb[15].mxu0 }
 0x631   :  { %916 = vmatpush3.bf16.msra.mxu1 %v688_v46 }
 0x634   :  { %918 = vmatmul.mubr.msk.bf16.vlgmr.msra.gmra.mrb[12].mxu1 %vm171_vm1, %v1102_v16 }
 0x707   :  { %v730_v49 = vpop.f32.mrb[12].mxu1 }
 0x708   :  { %v731_v50 = vadd.f32 %v808_v48, %v730_v49  ;;  %v919_v51 = vpop.f32.mrb[13].mxu1 }
 0x709   :  { %v733_v52 = vpop.f32.mrb[14].mxu1 }
 0x70a   :  { %737 = vst [vmem:[%s1287_s11] sm:$0xff] %v731_v50  ;;  %v734_v53 = vadd.f32 %v808_v48, %v733_v52  ;;  %v920_v54 = vpop.f32.mrb[15].mxu1 }
 0x70c   :  { %738 = vst [vmem:[%s1287_s11 + $0x8] sm:$0xff] %v734_v53 }

</bundles_post_ra>
